<compile_context>
chip_gen: v7x
topology: tpu7x:2x2x1
jax: 0.10.0
libtpu: 0.0.40
codegen_flags: <defaults>
</compile_context>

<pallas_src>
import jax
import jax.numpy as jnp
from jax.experimental import pallas as pl
from jax.experimental.pallas import tpu as pltpu


def _concat_kernel(emb_ref, pos_ref, out_ref):
    # emb_ref: (TB, TN, E)      VMEM — tile of the input embeddings
    # pos_ref: (TN, D)          VMEM — batch-invariant position-embedding tile
    # out_ref: (TB, TN, E + D)  VMEM — fused output tile
    tb, _, e = emb_ref.shape

    # Both stores are lane-dense (E and D are 128-multiples, E is the lane offset).
    out_ref[:, :, :e] = emb_ref[...]

    pos = pos_ref[...]  # load once; reused for every batch row in the tile

    def _store_row(i, carry):
        out_ref[i, :, e:] = pos
        return carry

    jax.lax.fori_loop(0, tb, _store_row, 0, unroll=True)


def _pick_seq_tile(n, cap):
    """Largest multiple-of-8 divisor of n that is <= cap; else n (full dim)."""
    best = None
    for dd in range(8, min(cap, n) + 1, 8):
        if n % dd == 0:
            best = dd
    return best if best is not None else n


def _pick_batch_tile(b, cap):
    """Largest divisor of b that is <= cap."""
    best = 1
    for dd in range(2, min(cap, b) + 1):
        if b % dd == 0:
            best = dd
    return best


def _next_smaller_divisor(total, cur):
    for dd in range(cur - 1, 0, -1):
        if total % dd == 0:
            return dd
    return 1


def position_embedding(emb, pe_table, size, *, block_budget_bytes=2 << 20):
    """emb: (B, N, E); pe_table: (size+1, D) (row 0 is the padding row)."""
    b, n, e = emb.shape
    vocab, d = pe_table.shape
    assert vocab == size + 1, "pe_table must have size+1 rows (row 0 = padding row)"
    if n < size:
        # The PyTorch module would also fail here (torch.cat seq-dim mismatch).
        raise ValueError("PositionEmbedding requires n >= size")
    # Guarantee lane-dense output stores (module default dim=512 satisfies this).
    assert e % 128 == 0 and d % 128 == 0, (
        "emb feature dim and pos dim must be multiples of 128 for lane-dense stores")

    # Static "gather": ids are arange(1, size+1), so pos_emb is a static slice of
    # the table; tail positions (ids == 0) are explicitly zero-filled (no reliance
    # on the padding row being zero).
    pos_emb = pe_table[1 : size + 1]
    if n > size:
        pos_emb = jnp.concatenate(
            [pos_emb, jnp.zeros((n - size, d), dtype=pe_table.dtype)], axis=0)
    pos_emb = pos_emb.astype(emb.dtype)  # (N, D), batch-invariant

    # --- Tile sizing: ~2 MiB blocks, sequence-axis tiling, >=8 steps if possible.
    itemsize = jnp.dtype(emb.dtype).itemsize
    unit = (2 * e + d) * itemsize  # HBM bytes moved per (batch-row, seq) element

    tn = _pick_seq_tile(n, max(8, block_budget_bytes // unit))
    tb = _pick_batch_tile(b, max(1, block_budget_bytes // (tn * unit)))

    # Prefer >=8 grid steps (pipeline overlap; >=4 per core on v7x's 2 TCs), but
    # never shrink a block below ~1 MiB — sub-MiB tiles lose HBM bandwidth.
    min_steps, min_block = 8, 1 << 20

    def _steps(tb_, tn_):
        return (b // tb_) * (n // tn_)

    while _steps(tb, tn) < min_steps and tb > 1:
        cand = _next_smaller_divisor(b, tb)
        if cand * tn * unit < min_block:
            break
        tb = cand
    while _steps(tb, tn) < min_steps:
        cand = _pick_seq_tile(n, tn - 1)
        if cand >= tn or tb * cand * unit < min_block:
            break
        tn = cand

    nj, ni = n // tn, b // tb

    # Explicit scoped-VMEM limit from the actual footprint (+ headroom), so tile
    # sizing is deliberate on every generation instead of hitting default limits.
    block_bytes = 2 * tb * tn * (2 * e + d) * itemsize  # emb + out, double-buffered
    pos_bytes = 2 * tn * d * itemsize                   # pos tile, double-buffered
    vmem_limit = int(min(block_bytes + pos_bytes + (8 << 20), 100 << 20))

    return pl.pallas_call(
        _concat_kernel,
        out_shape=jax.ShapeDtypeStruct((b, n, e + d), emb.dtype),
        # Batch axis innermost: the pos tile's block index changes only when the
        # outer (sequence) index changes, so it is re-fetched just nj times.
        grid=(nj, ni),
        in_specs=[
            pl.BlockSpec((tb, tn, e), lambda j, i: (i, j, 0)),  # emb tile
            pl.BlockSpec((tn, d), lambda j, i: (j, 0)),         # pos tile (seq-only)
        ],
        out_specs=pl.BlockSpec((tb, tn, e + d), lambda j, i: (i, j, 0)),
        compiler_params=pltpu.CompilerParams(
            dimension_semantics=("parallel", "parallel"),
            vmem_limit_bytes=vmem_limit,
        ),
    )(emb, pos_emb)


if __name__ == "__main__":
    # Small deterministic example. n > size exercises the zero-id tail; feature
    # dims are multiples of 128 so both output stores are lane-dense.
    B, SIZE, N, EMB_DIM, DIM = 2, 6, 8, 128, 128

    key = jax.random.PRNGKey(0)
    k_emb, k_pe = jax.random.split(key)

    # nn.Embedding(size+1, dim, padding_idx=0): N(0,1) init with row 0 zeroed.
    pe_table = jax.random.normal(k_pe, (SIZE + 1, DIM), dtype=jnp.float32)
    pe_table = pe_table.at[0].set(0.0)

    emb = jax.random.normal(k_emb, (B, N, EMB_DIM), dtype=jnp.float32)

    out = jax.block_until_ready(position_embedding(emb, pe_table, SIZE))

    # Pure-JAX reference mirroring the PyTorch forward.
    pos_ids = jnp.concatenate(
        [jnp.arange(1, SIZE + 1, dtype=jnp.int32),
         jnp.zeros((N - SIZE,), dtype=jnp.int32)])
    ref = jnp.concatenate(
        [emb, jnp.broadcast_to(pe_table[pos_ids][None], (B, N, DIM))], axis=-1)

    assert out.shape == (B, N, EMB_DIM + DIM)
    assert out.dtype == emb.dtype
    assert jnp.allclose(out, ref, atol=1e-6), "mismatch vs reference"
    print("KERNEL_OK")
</pallas_src>

<mosaic_0001>
module attributes {stable_mosaic.version = 11 : i64} {
  func.func @_concat_kernel(%arg0: i32, %arg1: i32, %arg2: memref<2x8x128xf32, #tpu.memory_space<vmem>>, %arg3: memref<8x128xf32, #tpu.memory_space<vmem>>, %arg4: memref<2x8x256xf32, #tpu.memory_space<vmem>>) attributes {dimension_semantics = [#tpu.dimension_semantics<parallel>, #tpu.dimension_semantics<parallel>], iteration_bounds = array<i64: 1, 1>, scalar_prefetch = 0 : i64, scratch_operands = 0 : i64, tpu.core_type = #tpu.core_type<tc>, window_params = [{transform_indices = @transform_0, window_bounds = array<i64: 2, 8, 128>}, {transform_indices = @transform_1, window_bounds = array<i64: 8, 128>}, {transform_indices = @transform_2, window_bounds = array<i64: 2, 8, 256>}]} {
    %c0 = arith.constant 0 : index
    %c0_0 = arith.constant 0 : index
    %c0_1 = arith.constant 0 : index
    %0 = vector.load %arg2[%c0, %c0_0, %c0_1] : memref<2x8x128xf32, #tpu.memory_space<vmem>>, vector<2x8x128xf32>
    %c0_2 = arith.constant 0 : index
    %c0_3 = arith.constant 0 : index
    %c0_4 = arith.constant 0 : index
    %1 = vector.load %arg4[%c0_2, %c0_3, %c0_4] : memref<2x8x256xf32, #tpu.memory_space<vmem>>, vector<2x8x128xf32>
    tpu.vector_store %arg4[%c0_2, %c0_3, %c0_4], %0 {strides = array<i32>} : memref<2x8x256xf32, #tpu.memory_space<vmem>>, vector<2x8x128xf32>,
    %c0_5 = arith.constant 0 : index
    %c0_6 = arith.constant 0 : index
    %2 = vector.load %arg3[%c0_5, %c0_6] : memref<8x128xf32, #tpu.memory_space<vmem>>, vector<8x128xf32>
    %c0_i32 = arith.constant 0 : i32
    %3 = arith.index_cast %c0_i32 : i32 to index
    %c0_7 = arith.constant 0 : index
    %c128 = arith.constant 128 : index
    %4 = vector.load %arg4[%3, %c0_7, %c128] : memref<2x8x256xf32, #tpu.memory_space<vmem>>, vector<1x8x128xf32>
    %5 = vector.shape_cast %4 : vector<1x8x128xf32> to vector<8x128xf32>
    %6 = vector.shape_cast %2 : vector<8x128xf32> to vector<1x8x128xf32>
    tpu.vector_store %arg4[%3, %c0_7, %c128], %6 {strides = array<i32>} : memref<2x8x256xf32, #tpu.memory_space<vmem>>, vector<1x8x128xf32>,
    %c1_i32 = arith.constant 1 : i32
    %7 = arith.index_cast %c1_i32 : i32 to index
    %c0_8 = arith.constant 0 : index
    %c128_9 = arith.constant 128 : index
    %8 = vector.load %arg4[%7, %c0_8, %c128_9] : memref<2x8x256xf32, #tpu.memory_space<vmem>>, vector<1x8x128xf32>
    %9 = vector.shape_cast %8 : vector<1x8x128xf32> to vector<8x128xf32>
    %10 = vector.shape_cast %2 : vector<8x128xf32> to vector<1x8x128xf32>
    tpu.vector_store %arg4[%7, %c0_8, %c128_9], %10 {strides = array<i32>} : memref<2x8x256xf32, #tpu.memory_space<vmem>>, vector<1x8x128xf32>,
    %c2_i32 = arith.constant 2 : i32
    return
  }
  func.func @transform_0(%arg0: i32, %arg1: i32) -> (i32, i32, i32) {
    %c0_i32 = arith.constant 0 : i32
    %c0_i32_0 = arith.constant 0 : i32
    return %arg1, %arg0, %c0_i32 : i32, i32, i32
  }
  func.func @transform_1(%arg0: i32, %arg1: i32) -> (i32, i32) {
    %c0_i32 = arith.constant 0 : i32
    %c0_i32_0 = arith.constant 0 : i32
    return %arg0, %c0_i32 : i32, i32
  }
  func.func @transform_2(%arg0: i32, %arg1: i32) -> (i32, i32, i32) {
    %c0_i32 = arith.constant 0 : i32
    %c0_i32_0 = arith.constant 0 : i32
    return %arg1, %arg0, %c0_i32 : i32, i32, i32
  }
}

</mosaic_0001>

<bundles_post_ra>
// kernel: tpu_custom_call.1
= control target key start
LH: loop header
LB: loop body
LE: loop exit
PB: predicated region body
PF: predicated region fallthrough
CT: control target
= control target key end

     0   :  { %7 = vsyncpa [#allocation3], 0  ;;  %s201_s0 = inlined_call_operand.hbm [shape: f32[2,8,128], index: 0, kind: input, shape index: {}]   ;;  %s202_s1 = inlined_call_operand.hbm [shape: f32[8,128], index: 1, kind: input, shape index: {}]   ;;  %s203_s2 = inlined_call_operand.hbm [shape: f32[2,8,256], index: 2, kind: output, shape index: {}]  }
   0x1   :  { %8 = vsyncpa [#allocation6], 0 }
   0x2   :  { %9 = vsyncpa [#allocation4], 0  ;;  %s143_s9 = smov [#allocation2]   ;;  %s71_s13 = scalar_lea.hbm %s201_s0, 256 }
   0x3   :  { %s15_s10 = sshll.u32 %s143_s9, 4  ;;  %p72_p0 = scmp.ne.s32.totalorder %s201_s0, %s71_s13  ;;  %s16_s10 = int_to_ptr.vmem [resolvable:$true] %s15_s10 }
   0x4   :  { %p75_p1 = scmp.lt.u32.totalorder %s71_s13, %s201_s0 }
   0x6   :  { %p77_p2 = pnand %p75_p1, %p72_p0 }
   0x8   :  { %80 = shalt.err (!%p77_p2)
}
   0x9   :  { %s81_s18 = scalar_lea.vmem %s16_s10, 256  ;;  %p86_p4 = scmp.lt.s32.totalorder %s16_s10, %s16_s10 }
   0xa   :  { %p82_p3 = scmp.ne.s32.totalorder %s16_s10, %s81_s18  ;;  %p87_p5 = scmp.lt.s32.totalorder %s81_s18, %s81_s18 }
   0xc   :  { %p88_p6 = por %p87_p5, %p86_p4 }
   0xe   :  { %p89_p7 = pnand %p88_p6, %p82_p3 }
  0x10   :  { %92 = shalt.err (!%p89_p7)
}
  0x11   :  { %s144_s19 = smov 128   ;;  %s145_s20 = smov 8  }
  0x12   :  { %21 = dma.hbm_to_vmem [thread:$0]  %s201_s0, 256, %s16_s10, [#allocation3], %s144_s19, %s144_s19, %s145_s20  }
  0x13   :  { %s146_s23 = smov [#allocation5]   ;;  %s93_s27 = scalar_lea.hbm %s202_s1, 128 }
  0x14   :  { %s28_s24 = sshll.u32 %s146_s23, 4  ;;  %p94_p8 = scmp.ne.s32.totalorder %s202_s1, %s93_s27  ;;  %s29_s24 = int_to_ptr.vmem [resolvable:$true] %s28_s24 }
  0x15   :  { %p97_p9 = scmp.lt.u32.totalorder %s93_s27, %s202_s1 }
  0x17   :  { %p99_p10 = pnand %p97_p9, %p94_p8 }
  0x19   :  { %102 = shalt.err (!%p99_p10)
}
  0x1a   :  { %s103_s4 = scalar_lea.vmem %s29_s24, 128  ;;  %p108_p12 = scmp.lt.s32.totalorder %s29_s24, %s29_s24 }
  0x1b   :  { %p104_p11 = scmp.ne.s32.totalorder %s29_s24, %s103_s4  ;;  %p109_p13 = scmp.lt.s32.totalorder %s103_s4, %s103_s4 }
  0x1d   :  { %p110_p0 = por %p109_p13, %p108_p12 }
  0x1f   :  { %p111_p1 = pnand %p110_p0, %p104_p11 }
  0x21   :  { %114 = shalt.err (!%p111_p1)
}
  0x22   :  { %31 = dma.hbm_to_vmem [thread:$0]  %s202_s1, 128, %s29_s24, [#allocation6]  }
  0x23   :  { %137 = dma.done.wait [#allocation3], 256  }
  0x24   :  { %138 = vsyncadd [#allocation3], 4294967040 }
  0x25   :  { %139 = dma.done.wait [#allocation6], 128  }
  0x26   :  { %140 = vsyncadd [#allocation6], 4294967168  ;;  %s147_s6 = smov [#allocation7]   ;;  %v38_v0 = vld [vmem:[#allocation2] sm:$0xff]  ;;  %v39_v1 = vld [vmem:[#allocation2 + $0x8] sm:$0xff] }
  0x27   :  { %s51_s7 = sshll.u32 %s147_s6, 4  ;;  %v42_v2 = vld [vmem:[#allocation5] sm:$0xff]  ;;  %40 = vst [vmem:[#allocation7] sm:$0xff] %v38_v0  ;;  %41 = vst [vmem:[#allocation7 + $0x10] sm:$0xff] %v39_v1  ;;  %s52_s7 = int_to_ptr.vmem [resolvable:$true] %s51_s7 }
  0x28   :  { %43 = vst [vmem:[#allocation7 + $0x8] sm:$0xff] %v42_v2  ;;  %45 = vst [vmem:[#allocation7 + $0x18] sm:$0xff] %v42_v2  ;;  %s115_s8 = scalar_lea.vmem %s52_s7, 512  ;;  %p120_p3 = scmp.lt.s32.totalorder %s52_s7, %s52_s7 }
  0x29   :  { %p116_p2 = scmp.ne.s32.totalorder %s52_s7, %s115_s8  ;;  %p121_p4 = scmp.lt.s32.totalorder %s115_s8, %s115_s8 }
  0x2b   :  { %p122_p5 = por %p121_p4, %p120_p3 }
  0x2d   :  { %p123_p6 = pnand %p122_p5, %p116_p2 }
  0x2f   :  { %126 = shalt.err (!%p123_p6)
}
  0x30   :  { %s127_s10 = scalar_lea.hbm %s203_s2, 512 }
  0x31   :  { %p128_p7 = scmp.ne.s32.totalorder %s203_s2, %s127_s10  ;;  %p131_p8 = scmp.lt.u32.totalorder %s127_s10, %s203_s2 }
  0x33   :  { %p133_p9 = pnand %p131_p8, %p128_p7 }
  0x35   :  { %136 = shalt.err (!%p133_p9)
}
  0x36   :  { %s148_s15 = smov 256   ;;  %s149_s16 = smov 16  }
  0x37   :  { %57 = dma.vmem_to_hbm [thread:$0]  %s52_s7, 512, %s203_s2, [#allocation4], %s148_s15, %s148_s15, %s149_s16  }
  0x38   :  { %141 = dma.done.wait [#allocation4], 512  }
  0x39   :  { %142 = vsyncadd [#allocation4], 4294966784 }
  0x3a   :  { %61 = vsyncpa [#allocation3], 1 }
  0x3b   :  { %62 = vsyncpa [#allocation6], 1 }
  0x3c   :  { %63 = vsyncpa [#allocation4], 1 }

</bundles_post_ra>
